<compile_context>
chip_gen: v7x
topology: tpu7x:2x2x1
jax: 0.10.0
libtpu: 0.0.40
codegen_flags: <defaults>
</compile_context>

<pallas_src>
import functools

import numpy as np
import jax
import jax.numpy as jnp
from jax.experimental import pallas as pl
from jax.experimental.pallas import tpu as pltpu


_LANE = 128
_SUBLANE = 8
_MAX_TAIL_UNROLL = 128                 # cap on statically-unrolled tail stores
_TARGET_TILE_BYTES = 2 * 1024 * 1024   # ~2 MiB output tile per grid step


def _flat_pad_kernel(x_ref, o_ref, *, sf, f, pad):
    """2-D lane-dense path. x_ref: (TB, S*F), o_ref: (TB, (S+pad)*F)."""
    # Bulk copy: direct slice-to-slice store, no reuse of a materialized block.
    o_ref[:, :sf] = x_ref[...]
    # Last F-wide slice of every row, replicated `pad` times along lanes.
    last = x_ref[:, sf - f:]                                   # (TB, F)
    if f == 1:
        # dim was the last axis: plain lane-broadcast of a single column.
        o_ref[:, sf:] = jnp.broadcast_to(last, (o_ref.shape[0], pad))
    else:
        # `pad` is a compile-time constant; plain slice stores only (no
        # in-kernel reshape/tile relayouts).
        for k in range(pad):
            o_ref[:, sf + k * f: sf + (k + 1) * f] = last


def _block_pad_kernel(x_ref, o_ref, *, s, pad):
    """3-D path for F >= 128 (already lane-dense). x:(TB,S,F), o:(TB,S+pad,F)."""
    o_ref[:, :s, :] = x_ref[...]
    last = x_ref[:, s - 1:s, :]                                # (TB, 1, F)
    o_ref[:, s:, :] = jnp.broadcast_to(
        last, (o_ref.shape[0], pad, x_ref.shape[-1]))


def _choose_tb(b, out_row_bytes):
    """Pick a B-tile: as big as fits ~_TARGET_TILE_BYTES, multiple of 8."""
    tb = max(1, _TARGET_TILE_BYTES // max(1, out_row_bytes))
    if tb >= b or b <= _SUBLANE:
        return b
    return max(_SUBLANE, (tb // _SUBLANE) * _SUBLANE)


def pad_to_minimum(features, minimum_size, dim):
    """JAX/Pallas equivalent of PadToMinimum(minimum_size, dim).forward."""
    ndim = features.ndim
    dim = dim % ndim
    shape = features.shape
    orig = shape[dim]
    if orig >= minimum_size:
        # PyTorch module returns the input unchanged in this case.
        return features

    pad = minimum_size - orig
    B = int(np.prod(shape[:dim], dtype=np.int64))
    F = int(np.prod(shape[dim + 1:], dtype=np.int64))
    itemsize = jnp.dtype(features.dtype).itemsize
    out_shape = shape[:dim] + (minimum_size,) + shape[dim + 1:]
    compiler_params = pltpu.CompilerParams(dimension_semantics=("parallel",))

    use_flat = (F < _LANE) and (pad <= _MAX_TAIL_UNROLL)

    if use_flat:
        # Lane-dense layout: fold (S, F) onto the lane axis (pure reshape).
        sf = orig * F
        of = minimum_size * F
        x2 = features.reshape(B, sf)
        tb = _choose_tb(B, of * itemsize)
        kernel = functools.partial(_flat_pad_kernel, sf=sf, f=F, pad=pad)
        out2 = pl.pallas_call(
            kernel,
            out_shape=jax.ShapeDtypeStruct((B, of), features.dtype),
            grid=(pl.cdiv(B, tb),),
            in_specs=[pl.BlockSpec((tb, sf), lambda b: (b, 0))],
            out_specs=pl.BlockSpec((tb, of), lambda b: (b, 0)),
            compiler_params=compiler_params,
        )(x2)
        return out2.reshape(out_shape)

    # F >= 128 (lane axis already dense) or very large pad: 3-D blocked path.
    x3 = features.reshape(B, orig, F)
    tb = _choose_tb(B, minimum_size * F * itemsize)
    kernel = functools.partial(_block_pad_kernel, s=orig, pad=pad)
    out3 = pl.pallas_call(
        kernel,
        out_shape=jax.ShapeDtypeStruct((B, minimum_size, F), features.dtype),
        grid=(pl.cdiv(B, tb),),
        in_specs=[pl.BlockSpec((tb, orig, F), lambda b: (b, 0, 0))],
        out_specs=pl.BlockSpec((tb, minimum_size, F), lambda b: (b, 0, 0)),
        compiler_params=compiler_params,
    )(x3)
    return out3.reshape(out_shape)


def _reference(features, minimum_size, dim):
    # Pure-JAX reference mirroring the PyTorch forward.
    orig_size = features.shape[dim]
    if orig_size >= minimum_size:
        return features
    pad = minimum_size - orig_size
    last = jnp.take(features, jnp.array([orig_size - 1]), axis=dim)
    reps = [1] * features.ndim
    reps[dim] = pad
    padding = jnp.tile(last, reps)
    return jnp.concatenate([features, padding], axis=dim)


if __name__ == "__main__":
    key = jax.random.PRNGKey(0)
    # NCHW-style input; pad the H axis (dim=2) from 8 up to 16.
    x = jax.random.normal(key, (2, 4, 8, 16), dtype=jnp.float32)

    # F = 16 < 128 -> lane-dense flattened path.
    out = jax.block_until_ready(pad_to_minimum(x, 16, 2))
    ref = _reference(x, 16, 2)
    assert out.shape == (2, 4, 16, 16), out.shape
    assert out.dtype == x.dtype
    np.testing.assert_allclose(np.asarray(out), np.asarray(ref), rtol=0, atol=0)

    # dim is the last axis (F == 1) -> lane-broadcast tail.
    out_last = jax.block_until_ready(pad_to_minimum(x, 32, 3))
    np.testing.assert_allclose(np.asarray(out_last),
                               np.asarray(_reference(x, 32, 3)), rtol=0, atol=0)

    # F >= 128 -> 3-D blocked path (already lane-dense).
    y = jax.random.normal(jax.random.PRNGKey(1), (2, 3, 256), dtype=jnp.float32)
    out_wide = jax.block_until_ready(pad_to_minimum(y, 8, 1))
    np.testing.assert_allclose(np.asarray(out_wide),
                               np.asarray(_reference(y, 8, 1)), rtol=0, atol=0)

    # No-op path (orig_size >= minimum_size): identity.
    out_noop = jax.block_until_ready(pad_to_minimum(x, 4, 2))
    np.testing.assert_allclose(np.asarray(out_noop), np.asarray(x))

    print("KERNEL_OK")
</pallas_src>

<mosaic_0001>
module attributes {stable_mosaic.version = 11 : i64} {
  func.func @_flat_pad_kernel(%arg0: i32, %arg1: memref<8x128xf32, #tpu.memory_space<vmem>>, %arg2: memref<8x256xf32, #tpu.memory_space<vmem>>) attributes {dimension_semantics = [#tpu.dimension_semantics<parallel>], iteration_bounds = array<i64: 1>, scalar_prefetch = 0 : i64, scratch_operands = 0 : i64, tpu.core_type = #tpu.core_type<tc>, window_params = [{transform_indices = @transform_0, window_bounds = array<i64: 8, 128>}, {transform_indices = @transform_1, window_bounds = array<i64: 8, 256>}]} {
    %c0 = arith.constant 0 : index
    %c0_0 = arith.constant 0 : index
    %0 = vector.load %arg1[%c0, %c0_0] : memref<8x128xf32, #tpu.memory_space<vmem>>, vector<8x128xf32>
    %c0_1 = arith.constant 0 : index
    %c0_2 = arith.constant 0 : index
    %1 = vector.load %arg2[%c0_1, %c0_2] : memref<8x256xf32, #tpu.memory_space<vmem>>, vector<8x128xf32>
    tpu.vector_store %arg2[%c0_1, %c0_2], %0 {strides = array<i32>} : memref<8x256xf32, #tpu.memory_space<vmem>>, vector<8x128xf32>,
    %c0_3 = arith.constant 0 : index
    %c112 = arith.constant 112 : index
    %2 = vector.load %arg1[%c0_3, %c112] : memref<8x128xf32, #tpu.memory_space<vmem>>, vector<8x16xf32>
    %c0_4 = arith.constant 0 : index
    %c128 = arith.constant 128 : index
    %3 = vector.load %arg2[%c0_4, %c128] : memref<8x256xf32, #tpu.memory_space<vmem>>, vector<8x16xf32>
    tpu.vector_store %arg2[%c0_4, %c128], %2 {strides = array<i32>} : memref<8x256xf32, #tpu.memory_space<vmem>>, vector<8x16xf32>,
    %c0_5 = arith.constant 0 : index
    %c144 = arith.constant 144 : index
    %4 = vector.load %arg2[%c0_5, %c144] : memref<8x256xf32, #tpu.memory_space<vmem>>, vector<8x16xf32>
    tpu.vector_store %arg2[%c0_5, %c144], %2 {strides = array<i32>} : memref<8x256xf32, #tpu.memory_space<vmem>>, vector<8x16xf32>,
    %c0_6 = arith.constant 0 : index
    %c160 = arith.constant 160 : index
    %5 = vector.load %arg2[%c0_6, %c160] : memref<8x256xf32, #tpu.memory_space<vmem>>, vector<8x16xf32>
    tpu.vector_store %arg2[%c0_6, %c160], %2 {strides = array<i32>} : memref<8x256xf32, #tpu.memory_space<vmem>>, vector<8x16xf32>,
    %c0_7 = arith.constant 0 : index
    %c176 = arith.constant 176 : index
    %6 = vector.load %arg2[%c0_7, %c176] : memref<8x256xf32, #tpu.memory_space<vmem>>, vector<8x16xf32>
    tpu.vector_store %arg2[%c0_7, %c176], %2 {strides = array<i32>} : memref<8x256xf32, #tpu.memory_space<vmem>>, vector<8x16xf32>,
    %c0_8 = arith.constant 0 : index
    %c192 = arith.constant 192 : index
    %7 = vector.load %arg2[%c0_8, %c192] : memref<8x256xf32, #tpu.memory_space<vmem>>, vector<8x16xf32>
    tpu.vector_store %arg2[%c0_8, %c192], %2 {strides = array<i32>} : memref<8x256xf32, #tpu.memory_space<vmem>>, vector<8x16xf32>,
    %c0_9 = arith.constant 0 : index
    %c208 = arith.constant 208 : index
    %8 = vector.load %arg2[%c0_9, %c208] : memref<8x256xf32, #tpu.memory_space<vmem>>, vector<8x16xf32>
    tpu.vector_store %arg2[%c0_9, %c208], %2 {strides = array<i32>} : memref<8x256xf32, #tpu.memory_space<vmem>>, vector<8x16xf32>,
    %c0_10 = arith.constant 0 : index
    %c224 = arith.constant 224 : index
    %9 = vector.load %arg2[%c0_10, %c224] : memref<8x256xf32, #tpu.memory_space<vmem>>, vector<8x16xf32>
    tpu.vector_store %arg2[%c0_10, %c224], %2 {strides = array<i32>} : memref<8x256xf32, #tpu.memory_space<vmem>>, vector<8x16xf32>,
    %c0_11 = arith.constant 0 : index
    %c240 = arith.constant 240 : index
    %10 = vector.load %arg2[%c0_11, %c240] : memref<8x256xf32, #tpu.memory_space<vmem>>, vector<8x16xf32>
    tpu.vector_store %arg2[%c0_11, %c240], %2 {strides = array<i32>} : memref<8x256xf32, #tpu.memory_space<vmem>>, vector<8x16xf32>,
    return
  }
  func.func @transform_0(%arg0: i32) -> (i32, i32) {
    %c0_i32 = arith.constant 0 : i32
    %c0_i32_0 = arith.constant 0 : i32
    return %arg0, %c0_i32 : i32, i32
  }
  func.func @transform_1(%arg0: i32) -> (i32, i32) {
    %c0_i32 = arith.constant 0 : i32
    %c0_i32_0 = arith.constant 0 : i32
    return %arg0, %c0_i32 : i32, i32
  }
}

</mosaic_0001>

<bundles_post_ra>
// kernel: tpu_custom_call.1
= control target key start
LH: loop header
LB: loop body
LE: loop exit
PB: predicated region body
PF: predicated region fallthrough
CT: control target
= control target key end

     0   :  { %6 = vsyncpa [#allocation3], 0  ;;  %s177_s0 = inlined_call_operand.hbm [shape: f32[8,128], index: 0, kind: input, shape index: {}]   ;;  %s178_s1 = inlined_call_operand.hbm [shape: f32[8,256], index: 1, kind: output, shape index: {}]  }
   0x1   :  { %7 = vsyncpa [#allocation4], 0  ;;  %s134_s6 = smov [#allocation2]   ;;  %s86_s10 = scalar_lea.hbm %s177_s0, 128 }
   0x2   :  { %s14_s7 = sshll.u32 %s134_s6, 4  ;;  %p87_p0 = scmp.ne.s32.totalorder %s177_s0, %s86_s10  ;;  %s15_s7 = int_to_ptr.vmem [resolvable:$true] %s14_s7 }
   0x3   :  { %p90_p1 = scmp.lt.u32.totalorder %s86_s10, %s177_s0 }
   0x5   :  { %p92_p2 = pnand %p90_p1, %p87_p0 }
   0x7   :  { %95 = shalt.err (!%p92_p2)
}
   0x8   :  { %s96_s15 = scalar_lea.vmem %s15_s7, 128  ;;  %p101_p4 = scmp.lt.s32.totalorder %s15_s7, %s15_s7 }
   0x9   :  { %p97_p3 = scmp.ne.s32.totalorder %s15_s7, %s96_s15  ;;  %p102_p5 = scmp.lt.s32.totalorder %s96_s15, %s96_s15 }
   0xb   :  { %p103_p6 = por %p102_p5, %p101_p4 }
   0xd   :  { %p104_p7 = pnand %p103_p6, %p97_p3 }
   0xf   :  { %107 = shalt.err (!%p104_p7)
}
  0x10   :  { %17 = dma.hbm_to_vmem [thread:$0]  %s177_s0, 128, %s15_s7, [#allocation3]  }
  0x11   :  { %130 = dma.done.wait [#allocation3], 128  }
  0x12   :  { %131 = vsyncadd [#allocation3], 4294967168  ;;  %v23_v0 = vld [vmem:[#allocation2] sm:$0xff]  ;;  %s135_s18 = smov 16   ;;  %s136_s19 = smov 48   ;;  %vm28_vm0 = vcmask 130048  }
  0x13   :  { %25 = vrot.lane.b32.xlu0 %v23_v0, %s135_s18  ;;  %35 = vrot.lane.b32.xlu1 %v23_v0, %s136_s19  ;;  %22 = vst [vmem:[#allocation5] sm:$0xff] %v23_v0  ;;  %s137_s20 = smov 32   ;;  %s138_s21 = smov 64   ;;  %vm33_vm1 = vcmask 261248   ;;  %vm38_vm2 = vcmask 392448   ;;  %vm43_vm3 = vcmask 523648  }
  0x14   :  { %s139_s22 = smov 80   ;;  %s140_s23 = smov 96   ;;  %vm48_vm4 = vcmask 654848   ;;  %vm53_vm5 = vcmask 786048   ;;  %vm58_vm6 = vcmask 917248   ;;  %vm60_vm7 = vcmask 1048448  }
  0x15   :  { %s141_s24 = smov 112   ;;  %s142_s0 = smov [#allocation5]  }
  0x16   :  { %s68_s25 = sshll.u32 %s142_s0, 4  ;;  %s69_s25 = int_to_ptr.vmem [resolvable:$true] %s68_s25 }
  0x17   :  { %30 = vrot.lane.b32.xlu0 %v23_v0, %s137_s20  ;;  %40 = vrot.lane.b32.xlu1 %v23_v0, %s138_s21  ;;  %s108_s26 = scalar_lea.vmem %s69_s25, 256  ;;  %p113_p9 = scmp.lt.s32.totalorder %s69_s25, %s69_s25 }
  0x18   :  { %p109_p8 = scmp.ne.s32.totalorder %s69_s25, %s108_s26  ;;  %p114_p10 = scmp.lt.s32.totalorder %s108_s26, %s108_s26 }
  0x1a   :  { %p115_p11 = por %p114_p10, %p113_p9 }
  0x1b   :  { %45 = vrot.lane.b32.xlu0 %v23_v0, %s139_s22  ;;  %50 = vrot.lane.b32.xlu1 %v23_v0, %s140_s23 }
  0x1c   :  { %p116_p12 = pnand %p115_p11, %p109_p8 }
  0x1f   :  { %55 = vrot.lane.b32.xlu0 %v23_v0, %s141_s24 }
  0x85   :  { %v26_v1 = vpop.permute.xlu0 %25  ;;  %v36_v2 = vpop.permute.xlu1 %35 }
  0x86   :  { %29 = vst.msk [vmem:[#allocation5 + $0x8] sm:$0xff] %vm28_vm0, %v26_v1 }
  0x89   :  { %v31_v3 = vpop.permute.xlu0 %30  ;;  %v41_v4 = vpop.permute.xlu1 %40 }
  0x8a   :  { %34 = vst.msk [vmem:[#allocation5 + $0x8] sm:$0xff] %vm33_vm1, %v31_v3 }
  0x8b   :  { %39 = vst.msk [vmem:[#allocation5 + $0x8] sm:$0xff] %vm38_vm2, %v36_v2 }
  0x8c   :  { %44 = vst.msk [vmem:[#allocation5 + $0x8] sm:$0xff] %vm43_vm3, %v41_v4 }
  0x8d   :  { %v46_v5 = vpop.permute.xlu0 %45  ;;  %v51_v6 = vpop.permute.xlu1 %50 }
  0x8e   :  { %49 = vst.msk [vmem:[#allocation5 + $0x8] sm:$0xff] %vm48_vm4, %v46_v5 }
  0x8f   :  { %54 = vst.msk [vmem:[#allocation5 + $0x8] sm:$0xff] %vm53_vm5, %v51_v6 }
  0x91   :  { %v56_v7 = vpop.permute.xlu0 %55 }
  0x92   :  { %59 = vst.msk [vmem:[#allocation5 + $0x8] sm:$0xff] %vm58_vm6, %v56_v7 }
  0x93   :  { %61 = vst.msk [vmem:[#allocation5 + $0x8] sm:$0xff] %vm60_vm7, %v23_v0 }
  0x94   :  { %119 = shalt.err (!%p116_p12)
}
  0x95   :  { %s120_s29 = scalar_lea.hbm %s178_s1, 256 }
  0x96   :  { %p121_p13 = scmp.ne.s32.totalorder %s178_s1, %s120_s29  ;;  %p124_p0 = scmp.lt.u32.totalorder %s120_s29, %s178_s1 }
  0x98   :  { %p126_p1 = pnand %p124_p0, %p121_p13 }
  0x9a   :  { %129 = shalt.err (!%p126_p1)
}
  0x9b   :  { %71 = dma.vmem_to_hbm [thread:$0]  %s69_s25, 256, %s178_s1, [#allocation4]  }
  0x9c   :  { %132 = dma.done.wait [#allocation4], 256  }
  0x9d   :  { %133 = vsyncadd [#allocation4], 4294967040 }
  0x9e   :  { %75 = vsyncpa [#allocation3], 1 }
  0x9f   :  { %76 = vsyncpa [#allocation4], 1 }

</bundles_post_ra>
